<compile_context>
chip_gen: v7x
topology: tpu7x:2x2x1
jax: 0.10.0
libtpu: 0.0.40
codegen_flags: <defaults>
</compile_context>

<pallas_src>
import functools

import jax
import jax.numpy as jnp
from jax.experimental import pallas as pl
from jax.experimental.pallas import tpu as pltpu


def _round_up(x, m):
    return (x + m - 1) // m * m


def _vmem_limit_bytes():
    """Per-generation VMEM request: leave headroom on v7x's 64 MiB per TC."""
    try:
        cap = pltpu.get_tpu_info().vmem_capacity_bytes
    except Exception:  # conservative fallback if the query is unavailable
        cap = 64 * 1024 * 1024
    return min(int(cap * 0.625), 80 * 1024 * 1024)


_VMEM_LIMIT = _vmem_limit_bytes()


def _pick_s_tile(s, kp, cp, vmem_limit):
    """Largest S tile (<= 512) whose fused working set fits the VMEM budget."""
    if s <= 512:
        return _round_up(s, 8)
    ts = 512
    while ts > 128:
        sp = _round_up(s, ts)
        need = (
            2 * ts * kp * 2      # double-buffered bf16 patch tile
            + 2 * kp * cp * 2    # resident bf16 weight (pipeliner reserves 2 bufs)
            + 2 * sp * cp * 4    # per-batch f32 output block (revisited)
            + 8 * cp * 4         # stats scratch (sublane-padded)
        )
        if need <= vmem_limit:
            break
        ts //= 2
    return ts


# ---------------- fused conv-GEMM + InstanceNorm + LeakyReLU kernel ----------
def _conv_in_lrelu_kernel(p_ref, w_ref, o_ref, stats_ref, *, inv_count, ts, n_s):
    """One (batch, S-tile) grid step.

    p_ref:     (1, TS, Kp)  bf16 im2col patches for this tile
    w_ref:     (Kp, Cp)     bf16 flattened conv weight (VMEM-resident)
    o_ref:     (1, Sp, Cp)  f32 per-batch output block, revisited across tiles
    stats_ref: (2, Cp)      f32 running [sum, sum_sq] for this batch
    """
    t = pl.program_id(1)

    @pl.when(t == 0)
    def _():
        stats_ref[...] = jnp.zeros_like(stats_ref)

    # Conv tile as a GEMM on the MXU (bf16 inputs, f32 accumulation).
    y = jnp.dot(p_ref[0], w_ref[...], preferred_element_type=jnp.float32)  # (TS, Cp)
    row0 = pl.multiple_of(t * ts, ts)
    o_ref[0, pl.ds(row0, ts), :] = y

    # Single (2, Cp) accumulate of [sum, sum_of_squares]; padded rows are zero.
    stats_ref[...] += jnp.concatenate(
        [jnp.sum(y, axis=0, keepdims=True),
         jnp.sum(y * y, axis=0, keepdims=True)],
        axis=0,
    )

    # After the batch's last tile: InstanceNorm + LeakyReLU(0.2) in place on the
    # VMEM-resident output block, which is then written back to HBM exactly once.
    @pl.when(t == n_s - 1)
    def _():
        mean = stats_ref[0:1, :] * inv_count                # (1, Cp)
        ex2 = stats_ref[1:2, :] * inv_count                 # (1, Cp)
        inv_std = jax.lax.rsqrt(ex2 - mean * mean + 1e-5)   # EUP rsqrt (f32 math)
        scale = inv_std
        shift = -mean * inv_std                             # y*scale+shift == (y-mean)*inv_std

        def body(i, carry):
            r0 = pl.multiple_of(i * ts, 8)
            yt = o_ref[0, pl.ds(r0, ts), :]
            yn = yt * scale + shift
            o_ref[0, pl.ds(r0, ts), :] = jnp.maximum(yn, 0.2 * yn)
            return carry

        jax.lax.fori_loop(0, n_s, body, 0, unroll=n_s <= 8)


def _im2col_reflect(x, stride):
    """NCHW -> patches [N, OH*OW, Cin*16] with PyTorch weight K-ordering."""
    n, c, h, w = x.shape
    kh = kw = 4
    x_pad = jnp.pad(x, ((0, 0), (0, 0), (1, 1), (1, 1)), mode="reflect")
    oh = (h + 2 - kh) // stride + 1
    ow = (w + 2 - kw) // stride + 1
    taps = []
    for i in range(kh):
        for j in range(kw):
            taps.append(
                x_pad[:, :, i : i + stride * oh : stride, j : j + stride * ow : stride]
            )
    patches = jnp.stack(taps, axis=2)                          # [N, C, 16, OH, OW]
    patches = patches.transpose(0, 3, 4, 1, 2).reshape(n, oh * ow, c * kh * kw)
    return patches, oh, ow


@functools.partial(jax.jit, static_argnames=("stride", "channels_last"))
def conv_block(x, weight, bias, *, stride, channels_last=False):
    """x: [N,Cin,H,W] f32; weight: [Cout,Cin,4,4]; bias: [Cout].

    Returns [N,Cout,OH,OW] (PyTorch layout), or [N,OH,OW,Cout] if channels_last
    (lets a chained discriminator skip the trailing transpose).
    """
    del bias  # exactly cancelled by InstanceNorm2d(affine=False): dead work.
    n, cin, h, w = x.shape
    cout = weight.shape[0]
    k = cin * 16

    # Cast to bf16 BEFORE the 16x im2col expansion (halves preamble HBM bytes).
    patches, oh, ow = _im2col_reflect(x.astype(jnp.bfloat16), stride)  # [N, S, K]
    s = oh * ow

    # MXU / vreg friendly padding: K, Cout -> multiples of 128; S -> tile mult.
    kp = _round_up(k, 128)
    cp = _round_up(cout, 128)
    ts = _pick_s_tile(s, kp, cp, _VMEM_LIMIT)
    sp = _round_up(s, ts)
    n_s = sp // ts

    patches = jnp.pad(patches, ((0, 0), (0, sp - s), (0, kp - k)))
    w_flat = weight.astype(jnp.bfloat16).reshape(cout, k).T            # [K, Cout]
    w_flat = jnp.pad(w_flat, ((0, kp - k), (0, cp - cout)))

    kernel = functools.partial(
        _conv_in_lrelu_kernel, inv_count=1.0 / s, ts=ts, n_s=n_s)

    out = pl.pallas_call(
        kernel,
        out_shape=jax.ShapeDtypeStruct((n, sp, cp), jnp.float32),
        grid=(n, n_s),
        in_specs=[
            pl.BlockSpec((1, ts, kp), lambda b, t: (b, t, 0)),
            # Constant index_map keeps the weight VMEM-resident (no re-DMA).
            pl.BlockSpec((kp, cp), lambda b, t: (0, 0)),
        ],
        # Same block index for every S tile -> the whole per-batch output stays
        # resident in VMEM across the "arbitrary" t axis; written to HBM once.
        out_specs=pl.BlockSpec((1, sp, cp), lambda b, t: (b, 0, 0)),
        scratch_shapes=[pltpu.VMEM((2, cp), jnp.float32)],
        compiler_params=pltpu.CompilerParams(
            dimension_semantics=("parallel", "arbitrary"),
            vmem_limit_bytes=_VMEM_LIMIT,
        ),
    )(patches, w_flat)

    out = out[:, :s, :cout].reshape(n, oh, ow, cout)
    if channels_last:
        return out
    return out.transpose(0, 3, 1, 2)


def _reference(x, weight, bias, stride):
    """Pure-JAX f32 reference of the PyTorch ConvBlock (bias included)."""
    x_pad = jnp.pad(x, ((0, 0), (0, 0), (1, 1), (1, 1)), mode="reflect")
    y = jax.lax.conv_general_dilated(
        x_pad, weight, window_strides=(stride, stride), padding="VALID",
        dimension_numbers=("NCHW", "OIHW", "NCHW"))
    y = y + bias.reshape(1, -1, 1, 1)
    mean = jnp.mean(y, axis=(2, 3), keepdims=True)
    var = jnp.mean((y - mean) ** 2, axis=(2, 3), keepdims=True)
    yn = (y - mean) * jax.lax.rsqrt(var + 1e-5)
    return jnp.where(yn > 0, yn, 0.2 * yn)


if __name__ == "__main__":
    key = jax.random.PRNGKey(0)

    def _make(n, cin, cout, hw, tag):
        kx, kw_, kb = jax.random.split(jax.random.fold_in(key, tag), 3)
        x = jax.random.normal(kx, (n, cin, hw, hw), dtype=jnp.float32)
        fan_in = cin * 16
        w = jax.random.normal(kw_, (cout, cin, 4, 4), dtype=jnp.float32) * (1.0 / fan_in) ** 0.5
        b = jax.random.normal(kb, (cout,), dtype=jnp.float32) * 0.01
        return x, w, b

    # Case 1: module-sized shapes (N=2, Cin=4, Cout=8, 16x16, stride 2).
    x, w, b = _make(2, 4, 8, 16, 0)
    y = conv_block(x, w, b, stride=2)
    jax.block_until_ready(y)
    assert y.shape == (2, 8, 8, 8), y.shape
    err = float(jnp.max(jnp.abs(y - _reference(x, w, b, 2))))
    assert err < 0.15, f"stride-2 max abs err {err}"   # bf16 MXU inputs

    # Case 2: stride 1 with S > TS so the multi-tile stats/normalize path runs.
    x2, w2, b2 = _make(1, 3, 8, 34, 1)
    y2 = conv_block(x2, w2, b2, stride=1)
    jax.block_until_ready(y2)
    assert y2.shape == (1, 8, 33, 33), y2.shape
    err2 = float(jnp.max(jnp.abs(y2 - _reference(x2, w2, b2, 1))))
    assert err2 < 0.15, f"stride-1 max abs err {err2}"

    print("KERNEL_OK")
</pallas_src>

<mosaic_0001>
module attributes {stable_mosaic.version = 11 : i64} {
  func.func @_conv_in_lrelu_kernel(%arg0: i32, %arg1: i32, %arg2: memref<1x64x128xbf16, #tpu.memory_space<vmem>>, %arg3: memref<128x128xbf16, #tpu.memory_space<vmem>>, %arg4: memref<1x64x128xf32, #tpu.memory_space<vmem>>, %arg5: memref<2x128xf32, #tpu.memory_space<vmem>>) attributes {dimension_semantics = [#tpu.dimension_semantics<parallel>, #tpu.dimension_semantics<arbitrary>], iteration_bounds = array<i64: 2, 1>, scalar_prefetch = 0 : i64, scratch_operands = 1 : i64, tpu.core_type = #tpu.core_type<tc>, window_params = [{transform_indices = @transform_0, window_bounds = array<i64: 1, 64, 128>}, {pipeline_mode = #tpu.pipeline_mode<synchronous>, transform_indices = @transform_1, window_bounds = array<i64: 128, 128>}, {transform_indices = @transform_2, window_bounds = array<i64: 1, 64, 128>}]} {
    %c0_i32 = arith.constant 0 : i32
    %0 = arith.cmpi eq, %arg1, %c0_i32 : i32
    %1 = arith.extui %0 : i1 to i32
    %c0_i32_0 = arith.constant 0 : i32
    %2 = arith.cmpi ne, %1, %c0_i32_0 : i32
    scf.if %2 {
      %cst_15 = arith.constant 0.000000e+00 : f32
      %25 = vector.broadcast %cst_15 : f32 to vector<2x128xf32>
      %c0_16 = arith.constant 0 : index
      %c0_17 = arith.constant 0 : index
      %26 = vector.load %arg5[%c0_16, %c0_17] : memref<2x128xf32, #tpu.memory_space<vmem>>, vector<2x128xf32>
      tpu.vector_store %arg5[%c0_16, %c0_17], %25 {strides = array<i32>} : memref<2x128xf32, #tpu.memory_space<vmem>>, vector<2x128xf32>,
    } else {
    }
    %c0 = arith.constant 0 : index
    %c0_1 = arith.constant 0 : index
    %c0_2 = arith.constant 0 : index
    %3 = vector.load %arg2[%c0, %c0_1, %c0_2] : memref<1x64x128xbf16, #tpu.memory_space<vmem>>, vector<1x64x128xbf16>
    %4 = vector.shape_cast %3 : vector<1x64x128xbf16> to vector<64x128xbf16>
    %c0_3 = arith.constant 0 : index
    %c0_4 = arith.constant 0 : index
    %5 = vector.load %arg3[%c0_3, %c0_4] : memref<128x128xbf16, #tpu.memory_space<vmem>>, vector<128x128xbf16>
    %cst = arith.constant dense<0.000000e+00> : vector<64x128xf32>
    %6 = tpu.matmul %4, %5, %cst {dimension_numbers = #tpu.dot_dimension_numbers<[1], [0], [0], [1], [0, 0, 1, 1], [], []>} : vector<64x128xbf16>, vector<128x128xbf16>, vector<64x128xf32> -> vector<64x128xf32>
    %c64_i32 = arith.constant 64 : i32
    %7 = arith.muli %arg1, %c64_i32 : i32
    %8 = tpu.assume_multiple %7, 64 : i32
    %c0_5 = arith.constant 0 : index
    %9 = arith.index_cast %8 : i32 to index
    %c0_6 = arith.constant 0 : index
    %10 = vector.load %arg4[%c0_5, %9, %c0_6] : memref<1x64x128xf32, #tpu.memory_space<vmem>>, vector<1x64x128xf32>
    %11 = vector.shape_cast %10 : vector<1x64x128xf32> to vector<64x128xf32>
    %12 = vector.shape_cast %6 : vector<64x128xf32> to vector<1x64x128xf32>
    tpu.vector_store %arg4[%c0_5, %9, %c0_6], %12 {strides = array<i32>} : memref<1x64x128xf32, #tpu.memory_space<vmem>>, vector<1x64x128xf32>,
    %c0_7 = arith.constant 0 : index
    %c0_8 = arith.constant 0 : index
    %13 = vector.load %arg5[%c0_7, %c0_8] : memref<2x128xf32, #tpu.memory_space<vmem>>, vector<2x128xf32>
    %cst_9 = arith.constant dense<0.000000e+00> : vector<128xf32>
    %14 = vector.multi_reduction <add>, %6, %cst_9 [0] : vector<64x128xf32> to vector<128xf32>
    %15 = vector.shape_cast %14 : vector<128xf32> to vector<1x128xf32>
    %16 = arith.mulf %6, %6 : vector<64x128xf32>
    %cst_10 = arith.constant dense<0.000000e+00> : vector<128xf32>
    %17 = vector.multi_reduction <add>, %16, %cst_10 [0] : vector<64x128xf32> to vector<128xf32>
    %18 = vector.shape_cast %17 : vector<128xf32> to vector<1x128xf32>
    %19 = tpu.concatenate %15, %18 in 0 : vector<1x128xf32>, vector<1x128xf32> -> vector<2x128xf32>
    %20 = arith.addf %13, %19 : vector<2x128xf32>
    %c0_11 = arith.constant 0 : index
    %c0_12 = arith.constant 0 : index
    %21 = vector.load %arg5[%c0_11, %c0_12] : memref<2x128xf32, #tpu.memory_space<vmem>>, vector<2x128xf32>
    tpu.vector_store %arg5[%c0_11, %c0_12], %20 {strides = array<i32>} : memref<2x128xf32, #tpu.memory_space<vmem>>, vector<2x128xf32>,
    %c0_i32_13 = arith.constant 0 : i32
    %22 = arith.cmpi eq, %arg1, %c0_i32_13 : i32
    %23 = arith.extui %22 : i1 to i32
    %c0_i32_14 = arith.constant 0 : i32
    %24 = arith.cmpi ne, %23, %c0_i32_14 : i32
    scf.if %24 {
      %c0_15 = arith.constant 0 : index
      %c0_16 = arith.constant 0 : index
      %25 = vector.load %arg5[%c0_15, %c0_16] : memref<2x128xf32, #tpu.memory_space<vmem>>, vector<1x128xf32>
      %cst_17 = arith.constant 1.562500e-02 : f32
      %26 = vector.broadcast %cst_17 : f32 to vector<1x128xf32>
      %27 = arith.mulf %25, %26 : vector<1x128xf32>
      %c1 = arith.constant 1 : index
      %c0_18 = arith.constant 0 : index
      %28 = vector.load %arg5[%c1, %c0_18] : memref<2x128xf32, #tpu.memory_space<vmem>>, vector<1x128xf32>
      %cst_19 = arith.constant 1.562500e-02 : f32
      %29 = vector.broadcast %cst_19 : f32 to vector<1x128xf32>
      %30 = arith.mulf %28, %29 : vector<1x128xf32>
      %31 = arith.mulf %27, %27 : vector<1x128xf32>
      %32 = arith.subf %30, %31 : vector<1x128xf32>
      %cst_20 = arith.constant 9.99999974E-6 : f32
      %33 = vector.broadcast %cst_20 : f32 to vector<1x128xf32>
      %34 = arith.addf %32, %33 : vector<1x128xf32>
      %35 = math.rsqrt %34 : vector<1x128xf32>
      %cst_21 = arith.constant 0.000000e+00 : f32
      %36 = vector.broadcast %cst_21 : f32 to vector<1x128xf32>
      %37 = arith.subf %36, %27 : vector<1x128xf32>
      %38 = arith.mulf %37, %35 : vector<1x128xf32>
      %c0_i32_22 = arith.constant 0 : i32
      %c64_i32_23 = arith.constant 64 : i32
      %39 = arith.muli %c0_i32_22, %c64_i32_23 : i32
      %40 = tpu.assume_multiple %39, 8 : i32
      %c0_24 = arith.constant 0 : index
      %41 = arith.index_cast %40 : i32 to index
      %c0_25 = arith.constant 0 : index
      %42 = vector.load %arg4[%c0_24, %41, %c0_25] : memref<1x64x128xf32, #tpu.memory_space<vmem>>, vector<1x64x128xf32>
      %43 = vector.shape_cast %42 : vector<1x64x128xf32> to vector<64x128xf32>
      %44 = vector.broadcast %35 : vector<1x128xf32> to vector<64x128xf32>
      %45 = arith.mulf %43, %44 : vector<64x128xf32>
      %46 = vector.broadcast %38 : vector<1x128xf32> to vector<64x128xf32>
      %47 = arith.addf %45, %46 : vector<64x128xf32>
      %cst_26 = arith.constant 2.000000e-01 : f32
      %48 = vector.broadcast %cst_26 : f32 to vector<64x128xf32>
      %49 = arith.mulf %48, %47 : vector<64x128xf32>
      %50 = arith.maximumf %47, %49 : vector<64x128xf32>
      %c0_27 = arith.constant 0 : index
      %51 = arith.index_cast %40 : i32 to index
      %c0_28 = arith.constant 0 : index
      %52 = vector.load %arg4[%c0_27, %51, %c0_28] : memref<1x64x128xf32, #tpu.memory_space<vmem>>, vector<1x64x128xf32>
      %53 = vector.shape_cast %52 : vector<1x64x128xf32> to vector<64x128xf32>
      %54 = vector.shape_cast %50 : vector<64x128xf32> to vector<1x64x128xf32>
      tpu.vector_store %arg4[%c0_27, %51, %c0_28], %54 {strides = array<i32>} : memref<1x64x128xf32, #tpu.memory_space<vmem>>, vector<1x64x128xf32>,
      %c1_i32 = arith.constant 1 : i32
    } else {
    }
    return
  }
  func.func @transform_0(%arg0: i32, %arg1: i32) -> (i32, i32, i32) {
    %c0_i32 = arith.constant 0 : i32
    %c0_i32_0 = arith.constant 0 : i32
    return %arg0, %arg1, %c0_i32 : i32, i32, i32
  }
  func.func @transform_1(%arg0: i32, %arg1: i32) -> (i32, i32) {
    %c0_i32 = arith.constant 0 : i32
    %c0_i32_0 = arith.constant 0 : i32
    %c0_i32_1 = arith.constant 0 : i32
    return %c0_i32, %c0_i32_0 : i32, i32
  }
  func.func @transform_2(%arg0: i32, %arg1: i32) -> (i32, i32, i32) {
    %c0_i32 = arith.constant 0 : i32
    %c0_i32_0 = arith.constant 0 : i32
    %c0_i32_1 = arith.constant 0 : i32
    return %arg0, %c0_i32, %c0_i32_0 : i32, i32, i32
  }
}

</mosaic_0001>

<bundles_post_ra>
// kernel: conv_block.1
= control target key start
LH: loop header
LB: loop body
LE: loop exit
PB: predicated region body
PF: predicated region fallthrough
CT: control target
= control target key end

     0   :  { %s684_s9 = smov 0   ;;  %s686_s10 = smov 0   ;;  %s775_s0 = inlined_call_operand.vmem [shape: bf16[2,64,128], index: 0, kind: input, shape index: {}]   ;;  %s776_s1 = inlined_call_operand.vmem [shape: bf16[128,128], index: 1, kind: input, shape index: {}]   ;;  %s777_s2 = inlined_call_operand.vmem [shape: f32[2,64,128], index: 2, kind: output, shape index: {}]  }
   0x1   :  { %s688_s11 = smov 0  }
   0x2 LB: > { %s24_s12 = sadd.s32 1, %s662_s10  ;;  %p532_p0 = scmp.ge.s32.totalorder %s666_s11, 1  ;;  %s666_s11 = sphi %s688_s11, %s12_s11   ;;  %s662_s10 = sphi %s686_s10, %s779_s10   ;;  %s658_s9 = sphi %s684_s9, %s778_s9  }
   0x3   : > { %p26_p1 = scmp.ge.s32.totalorder %s24_s12, 2  ;;  %p131_p2 = scmp.lt.s32.totalorder %s666_s11, 3 }
   0x5   : > { %s781_s12 = smov (%p26_p1, %s24_s12), 0  ;;  %p132_p3 = pnand %p532_p0, %p131_p2 }
   0x6   : > { %v630_v0 = vld [vmem:[%s776_s1] sm:$0xff] (!%p132_p3)   ;;  %p158_p4 = scmp.lt.s32.totalorder (!%p132_p3), %s658_s9, 1  ;;  %v631_v1 = vld [vmem:[%s776_s1 + $0x8] sm:$0xff] (!%p132_p3)   ;;  %v632_v2 = vld [vmem:[%s776_s1 + $0x10] sm:$0xff] (!%p132_p3)   ;;  %v668_v12 = vmov (!%p132_p3), 0.0   ;;  %vm384_vm0 = vcmask (!%p132_p3), 1040384  }
   0x7   : > { %135 = sbr.rel (%p132_p3) target bundleno = 328 (0x148), region = 28  ;;  %565 = vmatprep.subr.bf16.mxu0 (!%p132_p3), %v630_v0  ;;  %589 = vmatprep.subr.bf16.mxu1 (!%p132_p3), %v630_v0  ;;  %v633_v3 = vld [vmem:[%s776_s1 + $0x18] sm:$0xff] (!%p132_p3)   ;;  %v634_v6 = vld [vmem:[%s776_s1 + $0x20] sm:$0xff] (!%p132_p3)   ;;  %v635_v7 = vld [vmem:[%s776_s1 + $0x28] sm:$0xff] (!%p132_p3)   ;;  %177 = vst [vmem:[#allocation2] sm:$0x3] (!%p132_p3), %v668_v12 }
   0x8   : > { %566 = vmatpush3.bf16.msra.mxu0 (!%p132_p3), %v630_v0  ;;  %597 = vmatpush3.bf16.msra.mxu1 (!%p132_p3), %v630_v0  ;;  %v636_v8 = vld [vmem:[%s776_s1 + $0x30] sm:$0xff] (!%p132_p3)   ;;  %v637_v9 = vld [vmem:[%s776_s1 + $0x38] sm:$0xff] (!%p132_p3)  }
   0x9   : > { %567 = vmatprep.subr.bf16.mxu0 (!%p132_p3), %v631_v1  ;;  %590 = vmatprep.subr.bf16.mxu1 (!%p132_p3), %v631_v1 }
   0xc   : > { %568 = vmatpush3.bf16.msra.mxu0 (!%p132_p3), %v631_v1  ;;  %598 = vmatpush3.bf16.msra.mxu1 (!%p132_p3), %v631_v1  ;;  %v409_v1 = vlaneseq (!%p132_p3) }
   0xd   : > { %569 = vmatprep.subr.bf16.mxu0 (!%p132_p3), %v632_v2  ;;  %591 = vmatprep.subr.bf16.mxu1 (!%p132_p3), %v632_v2 }
   0xe   : > { %s783_s9 = smov (!%p158_p4, %s658_s9), 1  ;;  %v349_v53 = vld [vmem:[#allocation2] sm:$0x3] }
   0xf   : > { %s551_s19 = sshll.u32 %s783_s9, 5  ;;  %s552_s5 = sshll.u32 %s783_s9, 6 }
  0x10   : > { %s717_s22 = scalar_lea.vmem %s775_s0, %s551_s19  ;;  %570 = vmatpush3.bf16.msra.mxu0 %v632_v2  ;;  %599 = vmatpush3.bf16.msra.mxu1 %v632_v2  ;;  %v410_v2 = vshrl.u32 %v409_v1, 7  ;;  %s171_s8 = scalar_lea.vmem %s777_s2, %s552_s5 }
  0x11   : > { %v638_v4 = vld [vmem:[%s717_s22] sm:$0xff]   ;;  %v640_v5 = vld [vmem:[%s717_s22 + $0x10] sm:$0xff]   ;;  %571 = vmatprep.subr.bf16.mxu0 %v633_v3  ;;  %592 = vmatprep.subr.bf16.mxu1 %v633_v3  ;;  %v639_v10 = vld [vmem:[%s717_s22 + $0x8] sm:$0xff]  }
  0x12   : > { %581 = vmatprep.mubr.bf16.mxu0 %v638_v4  ;;  %585 = vmatprep.mubr.bf16.mxu1 %v640_v5  ;;  %v641_v11 = vld [vmem:[%s717_s22 + $0x18] sm:$0xff]  }
  0x14   : > { %572 = vmatpush3.bf16.msra.mxu0 %v633_v3  ;;  %600 = vmatpush3.bf16.msra.mxu1 %v633_v3  ;;  %v411_v3 = vsub.s32 0, %v410_v2 }
  0x15   : > { %573 = vmatprep.subr.bf16.mxu0 %v634_v6  ;;  %593 = vmatprep.subr.bf16.mxu1 %v634_v6 }
  0x18   : > { %574 = vmatpush3.bf16.msra.mxu0 %v634_v6  ;;  %601 = vmatpush3.bf16.msra.mxu1 %v634_v6 }
  0x19   : > { %575 = vmatprep.subr.bf16.mxu0 %v635_v7  ;;  %594 = vmatprep.subr.bf16.mxu1 %v635_v7 }
  0x1c   : > { %576 = vmatpush3.bf16.msra.mxu0 %v635_v7  ;;  %602 = vmatpush3.bf16.msra.mxu1 %v635_v7 }
  0x1d   : > { %577 = vmatprep.subr.bf16.mxu0 %v636_v8  ;;  %595 = vmatprep.subr.bf16.mxu1 %v636_v8 }
  0x20   : > { %578 = vmatpush3.bf16.msra.mxu0 %v636_v8  ;;  %603 = vmatpush3.bf16.msra.mxu1 %v636_v8 }
  0x21   : > { %579 = vmatprep.subr.bf16.mxu0 %v637_v9  ;;  %596 = vmatprep.subr.bf16.mxu1 %v637_v9 }
  0x24   : > { %580 = vmatpush3.bf16.msra.mxu0 %v637_v9  ;;  %604 = vmatpush3.bf16.msra.mxu1 %v637_v9 }
  0x27   : > { %582 = vmatmul.mubr.bf16.vlgmr.msra.gmra.mrb[0].mxu0 %v639_v10  ;;  %586 = vmatmul.mubr.bf16.vlgmr.msra.gmra.mrb[0].mxu1 %v641_v11 }
  0xfa   : > { %v738_v13 = vpop.f32.mrb[0].mxu0  ;;  %v740_v14 = vpop.f32.mrb[0].mxu1 }
  0xfb   : > { %v308_v15 = vpop.f32.mrb[1].mxu0  ;;  %v742_v16 = vpop.f32.mrb[1].mxu1  ;;  %v365_v24 = vmul.f32 %v738_v13, %v738_v13  ;;  %v369_v36 = vmul.f32 %v740_v14, %v740_v14 }
  0xfc   : > { %v584_v17 = vpop.f32.mrb[2].mxu0  ;;  %v744_v18 = vpop.f32.mrb[2].mxu1  ;;  %v363_v21 = vmul.f32 %v308_v15, %v308_v15  ;;  %v367_v30 = vmul.f32 %v742_v16, %v742_v16 }
  0xfd   : > { %v311_v19 = vpop.f32.mrb[3].mxu0  ;;  %v327_v20 = vpop.f32.mrb[3].mxu1  ;;  %v366_v27 = vmul.f32 %v584_v17, %v584_v17  ;;  %v370_v39 = vmul.f32 %v744_v18, %v744_v18 }
  0xfe   : > { %v350_v22 = vadd.f32 %v311_v19, %v308_v15  ;;  %v364_v23 = vmul.f32 %v311_v19, %v311_v19  ;;  %v368_v35 = vmul.f32 %v327_v20, %v327_v20 }
 0x100   : > { %v351_v25 = vadd.f32 %v738_v13, %v350_v22  ;;  %v371_v26 = vadd.f32 %v364_v23, %v363_v21 }
 0x102   : > { %v372_v28 = vadd.f32 %v371_v26, %v365_v24  ;;  %v352_v29 = vadd.f32 %v584_v17, %v351_v25 }
 0x104   : > { %v353_v31 = vadd.f32 %v352_v29, %v742_v16  ;;  %v373_v32 = vadd.f32 %v372_v28, %v366_v27 }
 0x106   : > { %v374_v33 = vadd.f32 %v373_v32, %v367_v30  ;;  %v354_v34 = vadd.f32 %v353_v31, %v327_v20 }
 0x108   : > { %v355_v37 = vadd.f32 %v740_v14, %v354_v34  ;;  %v375_v38 = vadd.f32 %v374_v33, %v368_v35 }
 0x10a   : > { %v356_v40 = vadd.f32 %v744_v18, %v355_v37  ;;  %v376_v41 = vadd.f32 %v375_v38, %v369_v36 }
 0x10c   : > { %v357_v42 = vrot.slane %v356_v40, 4  ;;  %v377_v43 = vadd.f32 %v376_v41, %v370_v39 }
 0x10e   : > { %v358_v44 = vadd.f32 %v357_v42, %v356_v40  ;;  %v378_v45 = vrot.slane %v377_v43, 4 }
 0x110   : > { %v359_v46 = vrot.slane %v358_v44, 2  ;;  %v379_v47 = vadd.f32 %v378_v45, %v377_v43 }
 0x112   : > { %v360_v48 = vadd.f32 %v359_v46, %v358_v44  ;;  %v380_v49 = vrot.slane %v379_v47, 2 }
 0x114   : > { %v361_v50 = vrot.slane %v360_v48, 1  ;;  %v381_v51 = vadd.f32 %v380_v49, %v379_v47 }
 0x116   : > { %v382_v52 = vrot.slane %v381_v51, 1  ;;  %v362_v54 = vadd.f32 %v361_v50, %v360_v48 }
 0x118   : > { %v383_v55 = vadd.f32 %v382_v52, %v381_v51 }
 0x11a   : > { %v385_v56 = vsel %vm384_vm0, %v362_v54, %v383_v55 }
 0x11b   : > { %v386_v57 = vadd.f32 %v385_v56, %v349_v53 }
 0x11d   : > { %387 = vst [vmem:[#allocation2] sm:$0x3] %v386_v57 }
 0x124   : > { %v391_v58 = vld [vmem:[#allocation2] sm:$0x1]  ;;  %v393_v59 = vld [vmem:[#allocation2 + $0x1] sm:$0x1] }
 0x125   : > { %v392_v60 = vmul.f32 0.015625, %v391_v58  ;;  %v394_v61 = vmul.f32 0.015625, %v393_v59 }
 0x127   : > { %v395_v62 = vmul.f32 %v392_v60, %v392_v60  ;;  %v399_v4 = vsub.f32 0.0, %v392_v60 }
 0x129   : > { %v396_v63 = vsub.f32 %v394_v61, %v395_v62 }
 0x12b   : > { %v397_v0 = vadd.f32 1e-05, %v396_v63 }
 0x12d   : > { %642 = vrsqrt.f32 %v397_v0 }
 0x137   : > { %v643_v5 = vpop.eup %642 }
 0x138   : > { %v400_v6 = vmul.f32 %v643_v5, %v399_v4  ;;  %v412_v7 = vrot.slane %v643_v5, %v411_v3 }
 0x13a   : > { %v413_v8 = vmul.f32 %v412_v7, %v308_v15  ;;  %v414_v9 = vmul.f32 %v412_v7, %v311_v19  ;;  %v415_v10 = vmul.f32 %v738_v13, %v412_v7  ;;  %v416_v11 = vmul.f32 %v584_v17, %v412_v7 }
 0x13b   : > { %v417_v12 = vmul.f32 %v412_v7, %v742_v16  ;;  %v418_v21 = vmul.f32 %v412_v7, %v327_v20  ;;  %v419_v22 = vmul.f32 %v740_v14, %v412_v7  ;;  %v420_v23 = vmul.f32 %v744_v18, %v412_v7 }
 0x13c   : > { %v424_v24 = vrot.slane %v400_v6, %v411_v3 }
 0x13e   : > { %v425_v25 = vadd.f32 %v424_v24, %v413_v8  ;;  %v426_v26 = vadd.f32 %v424_v24, %v414_v9  ;;  %v427_v27 = vadd.f32 %v424_v24, %v415_v10  ;;  %v428_v28 = vadd.f32 %v424_v24, %v416_v11 }
 0x13f   : > { %v429_v29 = vadd.f32 %v424_v24, %v417_v12  ;;  %v430_v30 = vadd.f32 %v424_v24, %v418_v21  ;;  %v431_v15 = vadd.f32 %v424_v24, %v419_v22  ;;  %v432_v19 = vadd.f32 %v424_v24, %v420_v23 }
 0x140   : > { %v433_v31 = vmul.f32 0.2, %v425_v25  ;;  %v434_v13 = vmul.f32 0.2, %v426_v26  ;;  %v435_v17 = vmul.f32 0.2, %v427_v27 }
 0x141   : > { %v436_v14 = vmul.f32 0.2, %v428_v28  ;;  %v437_v16 = vmul.f32 0.2, %v429_v29  ;;  %v438_v18 = vmul.f32 0.2, %v430_v30 }
 0x142   : > { %v439_v20 = vmul.f32 0.2, %v431_v15  ;;  %v440_v32 = vmul.f32 0.2, %v432_v19  ;;  %v441_v33 = vmax.f32 %v425_v25, %v433_v31  ;;  %v442_v34 = vmax.f32 %v426_v26, %v434_v13 }
 0x143   : > { %v443_v35 = vmax.f32 %v427_v27, %v435_v17  ;;  %v444_v36 = vmax.f32 %v428_v28, %v436_v14  ;;  %v445_v37 = vmax.f32 %v429_v29, %v437_v16  ;;  %v446_v38 = vmax.f32 %v430_v30, %v438_v18 }
 0x144   : > { %v447_v39 = vmax.f32 %v431_v15, %v439_v20  ;;  %v448_v40 = vmax.f32 %v432_v19, %v440_v32  ;;  %449 = vst [vmem:[%s171_s8] sm:$0xff] %v441_v33  ;;  %450 = vst [vmem:[%s171_s8 + $0x8] sm:$0xff] %v442_v34 }
 0x145   : > { %451 = vst [vmem:[%s171_s8 + $0x10] sm:$0xff] %v443_v35  ;;  %452 = vst [vmem:[%s171_s8 + $0x18] sm:$0xff] %v444_v36 }
 0x146   : > { %453 = vst [vmem:[%s171_s8 + $0x20] sm:$0xff] %v445_v37  ;;  %454 = vst [vmem:[%s171_s8 + $0x28] sm:$0xff] %v446_v38 }
 0x147   : > { %455 = vst [vmem:[%s171_s8 + $0x30] sm:$0xff] %v447_v39  ;;  %456 = vst [vmem:[%s171_s8 + $0x38] sm:$0xff] %v448_v40 }
 0x148 PF: > { %s12_s11 = sadd.s32 1, %s666_s11   ;;  %s778_s9 = smov %s662_s10 }
 0x149   : > { %p9_p5 = scmp.ge.s32.totalorder %s12_s11, 4   ;;  %s779_s10 = smov %s781_s12 }
 0x14b   :  { %11 = sbr.rel (!%p9_p5) target bundleno = 2 (0x2), region = 67 }

</bundles_post_ra>
